<compile_context>
chip_gen: v6e
topology: v6e:2x2x1
jax: 0.10.0
libtpu: 0.0.40
codegen_flags: <defaults>
</compile_context>

<pallas_src>
import jax
import jax.numpy as jnp
from jax import lax
from jax.experimental import pallas as pl
from jax.experimental.pallas import tpu as pltpu

EPS = 1e-5


# ----------------------------- helpers --------------------------------------


def _round_up(v, m):
    return ((v + m - 1) // m) * m


def _round_down(v, m):
    return (v // m) * m


def _physical_vmem_bytes():
    """Best-effort physical VMEM query; conservative (v7x per-TC) fallback."""
    try:
        info = pltpu.get_tpu_info()
        for attr in ("vmem_capacity_bytes", "vmem_bytes", "vmem_size_bytes"):
            v = getattr(info, attr, None)
            if isinstance(v, (int, float)) and v > 0:
                return int(v)
    except Exception:
        pass
    return 64 * 1024 * 1024  # v7x per-TensorCore VMEM (smallest of v5e/v6e/v7x)


def _choose_feat_tile(f_pad, max_feat_tile, min_steps=2):
    """Largest multiple of 128 that divides f_pad, fits max_feat_tile and (if
    possible) leaves at least `min_steps` grid steps for megacore sharding."""
    m = f_pad // 128
    max_d = max(1, min(m, max_feat_tile // 128))
    best = 1
    for d in range(1, m + 1):
        if m % d:
            continue
        steps = m // d
        if d <= max_d and (steps >= min_steps or d == 1):
            best = max(best, d)
    return 128 * best


# ----------------------------- kernels ---------------------------------------


def _bn_single_pass_kernel(x_ref, gb_ref, o_ref):
    # x_ref: (N, TF)  -- full batch resident, one feature tile per grid step.
    # gb_ref: (2, TF) -- row 0 = gamma, row 1 = beta (f32).
    x = x_ref[...].astype(jnp.float32)
    inv_n = jnp.float32(1.0 / x.shape[0])
    mean = jnp.sum(x, axis=0, keepdims=True) * inv_n              # (1, TF)
    diff = x - mean
    var = jnp.sum(diff * diff, axis=0, keepdims=True) * inv_n     # biased variance
    gb = gb_ref[...]
    scale = lax.rsqrt(var + EPS) * gb[0:1, :]                     # inv_std * gamma
    shift = gb[1:2, :] - mean * scale                             # beta - mean*scale
    o_ref[...] = (x * scale + shift).astype(o_ref.dtype)


def _bn_stats_kernel(x_ref, sum_ref, sumsq_ref):
    # grid = (feature tiles [parallel], batch tiles [arbitrary, last]).
    # Output blocks are resident across the batch axis -> use them as accumulators.
    b = pl.program_id(1)
    x = x_ref[...].astype(jnp.float32)

    @pl.when(b == 0)
    def _():
        sum_ref[...] = jnp.zeros_like(sum_ref)
        sumsq_ref[...] = jnp.zeros_like(sumsq_ref)

    sum_ref[...] += jnp.sum(x, axis=0, keepdims=True)
    sumsq_ref[...] += jnp.sum(x * x, axis=0, keepdims=True)


def _bn_apply_kernel(x_ref, ss_ref, o_ref):
    # ss_ref: (2, TF): row 0 = scale, row 1 = shift (precomputed in the wrapper).
    ss = ss_ref[...]
    y = x_ref[...].astype(jnp.float32) * ss[0:1, :] + ss[1:2, :]
    o_ref[...] = y.astype(o_ref.dtype)


# ----------------------------- wrapper ---------------------------------------


def batch_norm_2d(x, gamma, beta, dim1, dim2, *, force_two_pass=False):
    """x: (N, dim1, dim2) -> (N, dim1, dim2), matching nnBatch_Norm_2D.forward."""
    N = x.shape[0]
    F = dim1 * dim2
    assert x.shape == (N, dim1, dim2)
    assert gamma.shape == (F,) and beta.shape == (F,)

    itemsize = jnp.dtype(x.dtype).itemsize

    phys_vmem = _physical_vmem_bytes()
    vmem_limit = (2 * phys_vmem) // 3          # explicit scoped-VMEM limit
    tile_budget = (3 * vmem_limit) // 4        # headroom within that limit

    # Lane-dense features: pad F up to a multiple of 128 (sliced off at the end).
    F_pad = _round_up(F, 128)
    x2d = x.reshape(N, F)
    gamma_f = gamma.astype(jnp.float32)
    beta_f = beta.astype(jnp.float32)
    if F_pad != F:
        x2d = jnp.pad(x2d, ((0, 0), (0, F_pad - F)))
        gamma_f = jnp.pad(gamma_f, (0, F_pad - F), constant_values=1.0)
        beta_f = jnp.pad(beta_f, (0, F_pad - F))

    # Per-feature-column VMEM footprint for the single-pass kernel:
    # double-buffered input + output tiles (4 * itemsize) plus ~3 f32 temporaries.
    per_col_single = N * (4 * itemsize + 3 * 4)
    single_pass_ok = (per_col_single * 128 <= tile_budget) and not force_two_pass

    if single_pass_ok:
        # ---- single pass: full batch resident per feature tile ----
        max_ft = max(128, _round_down(tile_budget // per_col_single, 128))
        feat_tile = _choose_feat_tile(F_pad, max_ft, min_steps=2)
        gb = jnp.stack([gamma_f, beta_f], axis=0)                 # (2, F_pad) f32

        out2d = pl.pallas_call(
            _bn_single_pass_kernel,
            out_shape=jax.ShapeDtypeStruct((N, F_pad), x.dtype),
            grid_spec=pltpu.PrefetchScalarGridSpec(
                num_scalar_prefetch=0,
                grid=(F_pad // feat_tile,),
                in_specs=[
                    pl.BlockSpec((N, feat_tile), lambda j: (0, j)),
                    pl.BlockSpec((2, feat_tile), lambda j: (0, j)),
                ],
                out_specs=pl.BlockSpec((N, feat_tile), lambda j: (0, j)),
            ),
            compiler_params=pltpu.CompilerParams(
                dimension_semantics=("parallel",),
                vmem_limit_bytes=int(vmem_limit),
            ),
        )(x2d, gb)
    else:
        # ---- two-pass: batch-tiled (full batch need not fit VMEM) ----
        feat_tile = _choose_feat_tile(F_pad, 512, min_steps=2)
        per_elem = 4 * itemsize + 8                  # in+out double-buffered + f32 temps
        bn = max(8, _round_down(tile_budget // (per_elem * feat_tile), 8))
        bn = min(bn, _round_up(N, 8))
        N_pad = _round_up(N, bn)
        xp = x2d if N_pad == N else jnp.pad(x2d, ((0, N_pad - N), (0, 0)))
        # Zero-padded rows contribute 0 to sum / sumsq, so stats stay exact.

        sums, sumsqs = pl.pallas_call(
            _bn_stats_kernel,
            out_shape=(jax.ShapeDtypeStruct((1, F_pad), jnp.float32),
                       jax.ShapeDtypeStruct((1, F_pad), jnp.float32)),
            grid_spec=pltpu.PrefetchScalarGridSpec(
                num_scalar_prefetch=0,
                grid=(F_pad // feat_tile, N_pad // bn),
                in_specs=[pl.BlockSpec((bn, feat_tile), lambda f, b: (b, f))],
                out_specs=(pl.BlockSpec((1, feat_tile), lambda f, b: (0, f)),
                           pl.BlockSpec((1, feat_tile), lambda f, b: (0, f))),
            ),
            compiler_params=pltpu.CompilerParams(
                dimension_semantics=("parallel", "arbitrary"),
                vmem_limit_bytes=int(vmem_limit),
            ),
        )(xp)

        # Tiny (F,) math in plain JAX: fold stats + affine into scale/shift.
        inv_n = jnp.float32(1.0 / N)
        mean = sums * inv_n
        var = jnp.maximum(sumsqs * inv_n - mean * mean, 0.0)      # biased variance
        scale = gamma_f[None, :] * lax.rsqrt(var + EPS)
        shift = beta_f[None, :] - mean * scale
        ss = jnp.concatenate([scale, shift], axis=0)              # (2, F_pad) f32

        out2d = pl.pallas_call(
            _bn_apply_kernel,
            out_shape=jax.ShapeDtypeStruct((N_pad, F_pad), x.dtype),
            grid_spec=pltpu.PrefetchScalarGridSpec(
                num_scalar_prefetch=0,
                grid=(N_pad // bn, F_pad // feat_tile),
                in_specs=[pl.BlockSpec((bn, feat_tile), lambda i, j: (i, j)),
                          pl.BlockSpec((2, feat_tile), lambda i, j: (0, j))],
                out_specs=pl.BlockSpec((bn, feat_tile), lambda i, j: (i, j)),
            ),
            compiler_params=pltpu.CompilerParams(
                dimension_semantics=("parallel", "parallel"),
                vmem_limit_bytes=int(vmem_limit),
            ),
        )(xp, ss)

    out2d = out2d[:N, :F]
    return out2d.reshape(N, dim1, dim2)


# ----------------------------- reference & test ------------------------------


def reference_batch_norm_2d(x, gamma, beta, dim1, dim2):
    N = x.shape[0]
    F = dim1 * dim2
    x2d = x.reshape(N, F).astype(jnp.float32)
    mean = jnp.mean(x2d, axis=0, keepdims=True)
    var = jnp.mean((x2d - mean) ** 2, axis=0, keepdims=True)
    y = (x2d - mean) / jnp.sqrt(var + EPS) * gamma.reshape(1, F) + beta.reshape(1, F)
    return y.reshape(N, dim1, dim2).astype(x.dtype)


if __name__ == "__main__":
    # Small shapes consistent with the module: batch=16, dim1=4, dim2=32 -> F=128
    batch, dim1, dim2 = 16, 4, 32
    F = dim1 * dim2

    key = jax.random.PRNGKey(0)
    kx, kg, kb = jax.random.split(key, 3)
    x = jax.random.normal(kx, (batch, dim1, dim2), dtype=jnp.float32)
    # Deterministic params (PyTorch default is gamma=1, beta=0; exercise affine path).
    gamma = 1.0 + 0.1 * jax.random.normal(kg, (F,), dtype=jnp.float32)
    beta = 0.1 * jax.random.normal(kb, (F,), dtype=jnp.float32)

    ref = reference_batch_norm_2d(x, gamma, beta, dim1, dim2)

    # Single-pass (full batch resident) path.
    out = jax.block_until_ready(batch_norm_2d(x, gamma, beta, dim1, dim2))
    assert out.shape == (batch, dim1, dim2)
    assert jnp.allclose(out, ref, atol=1e-5, rtol=1e-5), "single-pass mismatch vs reference"

    # Batch-tiled two-pass path (used automatically for large N).
    out2 = jax.block_until_ready(
        batch_norm_2d(x, gamma, beta, dim1, dim2, force_two_pass=True))
    assert jnp.allclose(out2, ref, atol=1e-4, rtol=1e-4), "two-pass mismatch vs reference"

    print("KERNEL_OK")
</pallas_src>

<mosaic_0001>
module attributes {stable_mosaic.version = 11 : i64} {
  func.func @_bn_single_pass_kernel(%arg0: i32, %arg1: memref<16x128xf32, #tpu.memory_space<vmem>>, %arg2: memref<2x128xf32, #tpu.memory_space<vmem>>, %arg3: memref<16x128xf32, #tpu.memory_space<vmem>>) attributes {dimension_semantics = [#tpu.dimension_semantics<parallel>], iteration_bounds = array<i64: 1>, scalar_prefetch = 0 : i64, scratch_operands = 0 : i64, tpu.core_type = #tpu.core_type<tc>, window_params = [{transform_indices = @transform_0, window_bounds = array<i64: 16, 128>}, {transform_indices = @transform_1, window_bounds = array<i64: 2, 128>}, {transform_indices = @transform_2, window_bounds = array<i64: 16, 128>}]} {
    %c0 = arith.constant 0 : index
    %c0_0 = arith.constant 0 : index
    %0 = vector.load %arg1[%c0, %c0_0] : memref<16x128xf32, #tpu.memory_space<vmem>>, vector<16x128xf32>
    %cst = arith.constant dense<0.000000e+00> : vector<128xf32>
    %1 = vector.multi_reduction <add>, %0, %cst [0] : vector<16x128xf32> to vector<128xf32>
    %2 = vector.shape_cast %1 : vector<128xf32> to vector<1x128xf32>
    %cst_1 = arith.constant 6.250000e-02 : f32
    %3 = vector.broadcast %cst_1 : f32 to vector<1x128xf32>
    %4 = arith.mulf %2, %3 : vector<1x128xf32>
    %5 = vector.broadcast %4 : vector<1x128xf32> to vector<16x128xf32>
    %6 = arith.subf %0, %5 : vector<16x128xf32>
    %7 = arith.mulf %6, %6 : vector<16x128xf32>
    %cst_2 = arith.constant dense<0.000000e+00> : vector<128xf32>
    %8 = vector.multi_reduction <add>, %7, %cst_2 [0] : vector<16x128xf32> to vector<128xf32>
    %9 = vector.shape_cast %8 : vector<128xf32> to vector<1x128xf32>
    %cst_3 = arith.constant 6.250000e-02 : f32
    %10 = vector.broadcast %cst_3 : f32 to vector<1x128xf32>
    %11 = arith.mulf %9, %10 : vector<1x128xf32>
    %c0_4 = arith.constant 0 : index
    %c0_5 = arith.constant 0 : index
    %12 = vector.load %arg2[%c0_4, %c0_5] : memref<2x128xf32, #tpu.memory_space<vmem>>, vector<2x128xf32>
    %cst_6 = arith.constant 9.99999974E-6 : f32
    %13 = vector.broadcast %cst_6 : f32 to vector<1x128xf32>
    %14 = arith.addf %11, %13 : vector<1x128xf32>
    %15 = math.rsqrt %14 : vector<1x128xf32>
    %16 = vector.extract_strided_slice %12 {offsets = [0, 0], sizes = [1, 128], strides = [1, 1]} : vector<2x128xf32> to vector<1x128xf32>
    %17 = arith.mulf %15, %16 : vector<1x128xf32>
    %18 = vector.extract_strided_slice %12 {offsets = [1, 0], sizes = [1, 128], strides = [1, 1]} : vector<2x128xf32> to vector<1x128xf32>
    %19 = arith.mulf %4, %17 : vector<1x128xf32>
    %20 = arith.subf %18, %19 : vector<1x128xf32>
    %21 = vector.broadcast %17 : vector<1x128xf32> to vector<16x128xf32>
    %22 = arith.mulf %0, %21 : vector<16x128xf32>
    %23 = vector.broadcast %20 : vector<1x128xf32> to vector<16x128xf32>
    %24 = arith.addf %22, %23 : vector<16x128xf32>
    %c0_7 = arith.constant 0 : index
    %c0_8 = arith.constant 0 : index
    %25 = vector.load %arg3[%c0_7, %c0_8] : memref<16x128xf32, #tpu.memory_space<vmem>>, vector<16x128xf32>
    tpu.vector_store %arg3[%c0_7, %c0_8], %24 {strides = array<i32>} : memref<16x128xf32, #tpu.memory_space<vmem>>, vector<16x128xf32>,
    return
  }
  func.func @transform_0(%arg0: i32) -> (i32, i32) {
    %c0_i32 = arith.constant 0 : i32
    %c0_i32_0 = arith.constant 0 : i32
    return %c0_i32, %arg0 : i32, i32
  }
  func.func @transform_1(%arg0: i32) -> (i32, i32) {
    %c0_i32 = arith.constant 0 : i32
    %c0_i32_0 = arith.constant 0 : i32
    return %c0_i32, %arg0 : i32, i32
  }
  func.func @transform_2(%arg0: i32) -> (i32, i32) {
    %c0_i32 = arith.constant 0 : i32
    %c0_i32_0 = arith.constant 0 : i32
    return %c0_i32, %arg0 : i32, i32
  }
}

</mosaic_0001>

<bundles_post_ra>
// kernel: tpu_custom_call.1
= control target key start
LH: loop header
LB: loop body
LE: loop exit
PB: predicated region body
PF: predicated region fallthrough
CT: control target
= control target key end

     0   :  { %7 = vsyncpa [#allocation3], 0  ;;  %s209_s0 = inlined_call_operand.hbm [shape: f32[16,128], index: 0, kind: input, shape index: {}]   ;;  %s210_s1 = inlined_call_operand.hbm [shape: f32[2,128], index: 1, kind: input, shape index: {}]   ;;  %s211_s2 = inlined_call_operand.hbm [shape: f32[16,128], index: 2, kind: output, shape index: {}]  }
   0x1   :  { %8 = vsyncpa [#allocation6], 0 }
   0x2   :  { %9 = vsyncpa [#allocation4], 0  ;;  %s174_s9 = smov [#allocation2]  }
   0x3   :  { %s15_s10 = sshll.u32 %s174_s9, 4  ;;  %s16_s10 = int_to_ptr.vmem [resolvable:$true] %s15_s10 }
   0x4   :  { %s116_s11 = scalar_lea.vmem %s16_s10, 256  ;;  %p121_p1 = scmp.lt.s32.totalorder %s16_s10, %s16_s10 }
   0x5   :  { %p117_p0 = scmp.ne.s32.totalorder %s16_s10, %s116_s11  ;;  %p122_p2 = scmp.lt.s32.totalorder %s116_s11, %s116_s11 }
   0x7   :  { %p123_p3 = por %p122_p2, %p121_p1 }
   0x9   :  { %p124_p4 = pnand %p123_p3, %p117_p0 }
   0xb   :  { %127 = shalt.err (!%p124_p4)
}
   0xc   :  { %s175_s12 = smov 128   ;;  %s176_s13 = smov 8  }
   0xd   :  { %21 = dma.hbm_to_vmem [thread:$0]  %s209_s0, 256, %s16_s10, [#allocation3], %s175_s12, %s175_s12, %s176_s13  }
   0xe   :  { %s177_s16 = smov [#allocation5]  }
   0xf   :  { %s28_s17 = sshll.u32 %s177_s16, 4  ;;  %s29_s17 = int_to_ptr.vmem [resolvable:$true] %s28_s17 }
  0x10   :  { %s136_s18 = scalar_lea.vmem %s29_s17, 32  ;;  %p141_p6 = scmp.lt.s32.totalorder %s29_s17, %s29_s17 }
  0x11   :  { %p137_p5 = scmp.ne.s32.totalorder %s29_s17, %s136_s18  ;;  %p142_p7 = scmp.lt.s32.totalorder %s136_s18, %s136_s18 }
  0x13   :  { %p143_p8 = por %p142_p7, %p141_p6 }
  0x15   :  { %p144_p9 = pnand %p143_p8, %p137_p5 }
  0x17   :  { %147 = shalt.err (!%p144_p9)
}
  0x18   :  { %31 = dma.hbm_to_vmem [thread:$0]  %s210_s1, 32, %s29_s17, [#allocation6]  }
  0x19   :  { %168 = dma.done.wait [#allocation3], 256  }
  0x1a   :  { %169 = vsyncadd [#allocation3], 4294967040 }
  0x1b   :  { %170 = dma.done.wait [#allocation6], 32  }
  0x1c   :  { %171 = vsyncadd [#allocation6], 4294967264  ;;  %v38_v0 = vld [vmem:[#allocation2] sm:$0xff]  ;;  %v39_v1 = vld [vmem:[#allocation2 + $0x8] sm:$0xff]  ;;  %v69_v23 = vlaneseq  ;;  %s178_s0 = smov [#allocation7]  }
  0x1d   :  { %v40_v2 = vadd.f32 %v39_v1, %v38_v0  ;;  %v60_v25 = vld [vmem:[#allocation5] sm:$0x3]  ;;  %s88_s1 = sshll.u32 %s178_s0, 4  ;;  %s89_s1 = int_to_ptr.vmem [resolvable:$true] %s88_s1 }
  0x1e   :  { %v70_v24 = vshrl.u32 %v69_v23, 7  ;;  %s148_s21 = scalar_lea.vmem %s89_s1, 256  ;;  %p153_p11 = scmp.lt.s32.totalorder %s89_s1, %s89_s1 }
  0x1f   :  { %v41_v3 = vrot.slane %v40_v2, 4  ;;  %p149_p10 = scmp.ne.s32.totalorder %s89_s1, %s148_s21  ;;  %p154_p12 = scmp.lt.s32.totalorder %s148_s21, %s148_s21 }
  0x20   :  { %v71_v26 = vsub.s32 0, %v70_v24  ;;  %v77_v32 = vsub.s32 1, %v70_v24 }
  0x21   :  { %v42_v4 = vadd.f32 %v41_v3, %v40_v2  ;;  %p155_p13 = por %p154_p12, %p153_p11 }
  0x23   :  { %v43_v5 = vrot.slane %v42_v4, 2  ;;  %p156_p0 = pnand %p155_p13, %p149_p10 }
  0x25   :  { %v44_v6 = vadd.f32 %v43_v5, %v42_v4 }
  0x27   :  { %v45_v7 = vrot.slane %v44_v6, 1 }
  0x29   :  { %v46_v8 = vadd.f32 %v45_v7, %v44_v6 }
  0x2b   :  { %v47_v9 = vmul.f32 0.0625, %v46_v8 }
  0x2d   :  { %v48_v10 = vsub.f32 %v38_v0, %v47_v9  ;;  %v49_v11 = vsub.f32 %v39_v1, %v47_v9 }
  0x2f   :  { %v50_v12 = vmul.f32 %v48_v10, %v48_v10  ;;  %v51_v13 = vmul.f32 %v49_v11, %v49_v11 }
  0x31   :  { %v52_v14 = vadd.f32 %v51_v13, %v50_v12 }
  0x33   :  { %v53_v15 = vrot.slane %v52_v14, 4 }
  0x35   :  { %v54_v16 = vadd.f32 %v53_v15, %v52_v14 }
  0x37   :  { %v55_v17 = vrot.slane %v54_v16, 2 }
  0x39   :  { %v56_v18 = vadd.f32 %v55_v17, %v54_v16 }
  0x3b   :  { %v57_v19 = vrot.slane %v56_v18, 1 }
  0x3d   :  { %v58_v20 = vadd.f32 %v57_v19, %v56_v18 }
  0x3f   :  { %v59_v21 = vmul.f32 0.0625, %v58_v20 }
  0x41   :  { %v61_v22 = vadd.f32 1e-05, %v59_v21 }
  0x43   :  { %106 = vrsqrt.f32 %v61_v22 }
  0x50   :  { %v107_v27 = vpop.eup %106 }
  0x51   :  { %v63_v28 = vmul.f32 %v107_v27, %v60_v25 }
  0x53   :  { %v64_v29 = vmul.f32 %v63_v28, %v47_v9  ;;  %v72_v30 = vrot.slane %v63_v28, %v71_v26 }
  0x55   :  { %v66_v31 = vrot.slane %v64_v29, 7  ;;  %v73_v34 = vmul.f32 %v72_v30, %v38_v0  ;;  %v74_v35 = vmul.f32 %v72_v30, %v39_v1 }
  0x57   :  { %v68_v33 = vsub.f32 %v60_v25, %v66_v31 }
  0x59   :  { %v78_v36 = vrot.slane %v68_v33, %v77_v32 }
  0x5b   :  { %v79_v37 = vadd.f32 %v78_v36, %v73_v34  ;;  %v80_v38 = vadd.f32 %v78_v36, %v74_v35 }
  0x5d   :  { %81 = vst [vmem:[#allocation7] sm:$0xff] %v79_v37  ;;  %82 = vst [vmem:[#allocation7 + $0x8] sm:$0xff] %v80_v38 }
  0x5e   :  { %159 = shalt.err (!%p156_p0)
}
  0x5f   :  { %94 = dma.vmem_to_hbm [thread:$0]  %s89_s1, 256, %s211_s2, [#allocation4], %s175_s12, %s175_s12, %s176_s13  }
  0x60   :  { %172 = dma.done.wait [#allocation4], 256  }
  0x61   :  { %173 = vsyncadd [#allocation4], 4294967040 }
  0x62   :  { %98 = vsyncpa [#allocation3], 1 }
  0x63   :  { %99 = vsyncpa [#allocation6], 1 }
  0x64   :  { %100 = vsyncpa [#allocation4], 1 }

</bundles_post_ra>
